<compile_context>
chip_gen: v5e
topology: v5e:2x2
jax: 0.10.0
libtpu: 0.0.40
codegen_flags: <defaults>
</compile_context>

<pallas_src>
import jax
import jax.numpy as jnp
from jax.experimental import pallas as pl
from jax.experimental.pallas import tpu as pltpu


def _round_up(a, b):
    return (a + b - 1) // b * b


def _vmem_budget_bytes():
    """Per-step VMEM budget derived from the actual part (64 MiB v7x, 128 MiB v5e/v6e)."""
    cap = 64 * 1024 * 1024
    try:
        cap = int(pltpu.get_tpu_info().vmem_capacity_bytes)
    except Exception:
        pass
    return min(cap * 3 // 4, 100 * 1024 * 1024)


# --------------------------------------------------------------------------------------
# Primary kernel: fused in-kernel patch extraction + matmul + BN/ReLU epilogue.
# --------------------------------------------------------------------------------------
def _fused_kernel(x_ref, w_ref, scale_ref, bias_ref, o_ref):
    # x_ref:     (1, Cin, 8*th, W)   raw NCHW input rows (input dtype, straight from HBM)
    # w_ref:     (8, Cin*8, Coutp)   weight laid out (kw, (ci, kh), co), compute dtype, resident
    # scale_ref: (1, Coutp) f32      folded BN scale (applied on the f32 accumulator)
    # bias_ref:  (1, Coutp) f32      folded BN bias
    # o_ref:     (1, th, Wo, Coutp)  NHWC output tile (lane-dense: Coutp % 128 == 0)
    _, cin, hblk, w_full = x_ref.shape
    th = hblk // 8
    wo = w_full // 8
    cdt = w_ref.dtype
    scale = scale_ref[...]
    bias = bias_ref[...]
    for r in range(th):                                    # one output row per iteration
        xs = x_ref[0, :, r * 8:(r + 1) * 8, :]             # (Cin, 8, W)
        a = xs.reshape(cin * 8, w_full)                    # rows ordered (ci, kh) -- free merge
        b = jnp.transpose(a)                               # (W, Cin*8): rows ordered (wo, kw)
        b = b.reshape(wo, 8, cin * 8)                      # split rows into (wo, kw)
        acc = None
        for kw in range(8):                                # 8 accumulating MXU dots
            p = b[:, kw, :].astype(cdt)                    # (Wo, Cin*8) patch slice
            d = jnp.dot(p, w_ref[kw], preferred_element_type=jnp.float32)
            acc = d if acc is None else acc + d
        y = acc * scale + bias                             # BatchNorm (eval) epilogue in f32
        o_ref[0, r] = jnp.maximum(y, 0.0).astype(o_ref.dtype)   # ReLU


def _choose_fused_th(N, Cin, Ho, Wo, Coutp, x_esize, w_esize, out_esize, budget):
    """Largest ho-rows-per-step (divisor of Ho, <= 8) whose working set fits the budget."""
    w_bytes = 2 * 8 * Cin * 8 * Coutp * w_esize            # resident weight (x2: buffer safety)

    def step_bytes(th):
        x_bytes = 2 * Cin * 8 * th * Wo * 8 * x_esize      # double-buffered input tile
        o_bytes = 2 * th * Wo * Coutp * out_esize          # double-buffered output tile
        return w_bytes + x_bytes + o_bytes + 4 * Coutp * 4

    divs = [d for d in range(1, min(Ho, 8) + 1) if Ho % d == 0]
    fitting = [d for d in divs if step_bytes(d) <= budget]
    if not fitting:
        return None                                        # weight slab too big -> fallback path
    # Keep >= 2 grid steps whenever possible so both v7x TensorCores get work.
    preferred = [d for d in fitting if N * (Ho // d) >= 2] or fitting
    return max(preferred)


def _fused_downsample(x, weight, scale, bias, *, th, compute_dtype, out_dtype, vmem_limit):
    N, Cin, H, W = x.shape
    Cout = weight.shape[0]
    Ho, Wo = H // 8, W // 8
    Coutp = _round_up(Cout, 128)
    nhj = Ho // th

    # Weight laid out as (kw, (ci, kh), co); BN scale stays in the f32 epilogue (accuracy).
    w_r = weight.transpose(3, 1, 2, 0).reshape(8, Cin * 8, Cout).astype(compute_dtype)
    w_r = jnp.pad(w_r, ((0, 0), (0, 0), (0, Coutp - Cout)))
    scale2d = jnp.pad(scale, (0, Coutp - Cout)).reshape(1, Coutp)
    bias2d = jnp.pad(bias, (0, Coutp - Cout)).reshape(1, Coutp)

    out = pl.pallas_call(
        _fused_kernel,
        out_shape=jax.ShapeDtypeStruct((N, Ho, Wo, Coutp), out_dtype),
        grid_spec=pltpu.PrefetchScalarGridSpec(
            num_scalar_prefetch=0,
            grid=(N * nhj,),
            in_specs=[
                pl.BlockSpec((1, Cin, 8 * th, W), lambda g: (g // nhj, 0, g % nhj, 0)),
                pl.BlockSpec((8, Cin * 8, Coutp), lambda g: (0, 0, 0)),     # resident weight
                pl.BlockSpec((1, Coutp), lambda g: (0, 0)),
                pl.BlockSpec((1, Coutp), lambda g: (0, 0)),
            ],
            out_specs=pl.BlockSpec((1, th, Wo, Coutp), lambda g: (g // nhj, g % nhj, 0, 0)),
        ),
        compiler_params=pltpu.CompilerParams(
            dimension_semantics=("parallel",),
            vmem_limit_bytes=vmem_limit,
        ),
    )(x, w_r, scale2d, bias2d)
    return out[..., :Cout]                                 # (N, Ho, Wo, Cout)


# --------------------------------------------------------------------------------------
# Fallback kernel: wrapper-side im2col + tiled matmul (also handles very large weights).
# --------------------------------------------------------------------------------------
def _matmul_kernel(x_ref, w_ref, scale_ref, bias_ref, o_ref, *acc):
    # x_ref: (tm, tk)  w_ref: (tk, Coutp)  scale/bias: (1, Coutp) f32  o_ref: (tm, Coutp)
    d = jnp.dot(x_ref[...], w_ref[...], preferred_element_type=jnp.float32)
    if not acc:                                            # single K block: no accumulator trip
        y = d * scale_ref[...] + bias_ref[...]
        o_ref[...] = jnp.maximum(y, 0.0).astype(o_ref.dtype)
    else:
        acc_ref = acc[0]
        k = pl.program_id(1)

        @pl.when(k == 0)
        def _():
            acc_ref[...] = d                               # init with first dot (no zero+add)

        @pl.when(k > 0)
        def _():
            acc_ref[...] += d

        @pl.when(k == pl.num_programs(1) - 1)
        def _():
            y = acc_ref[...] * scale_ref[...] + bias_ref[...]
            o_ref[...] = jnp.maximum(y, 0.0).astype(o_ref.dtype)


def _matmul_downsample(x, weight, scale, bias, *, compute_dtype, out_dtype, budget):
    N, Cin, H, W = x.shape
    Cout = weight.shape[0]
    Ho, Wo = H // 8, W // 8
    M, K = N * Ho * Wo, Cin * 64
    Coutp = _round_up(Cout, 128)
    esize = jnp.dtype(compute_dtype).itemsize
    osize = jnp.dtype(out_dtype).itemsize

    # im2col: (M, K), K ordered (ci, kh, kw); fused by XLA with the compute-dtype cast.
    patches = x.reshape(N, Cin, Ho, 8, Wo, 8).transpose(0, 2, 4, 1, 3, 5)
    patches = patches.reshape(M, K).astype(compute_dtype)

    w_mat = weight.reshape(Cout, K).T.astype(compute_dtype)
    w_mat = jnp.pad(w_mat, ((0, 0), (0, Coutp - Cout)))
    scale2d = jnp.pad(scale, (0, Coutp - Cout)).reshape(1, Coutp)
    bias2d = jnp.pad(bias, (0, Coutp - Cout)).reshape(1, Coutp)

    # M tiling: 128-aligned (MXU / bf16 sublane packing); >= 2 tiles for v7x when possible.
    tm = min(512, _round_up(M, 128))
    if 256 <= M <= 512:
        tm = _round_up((M + 1) // 2, 128)
    Mp = _round_up(M, tm)
    if Mp != M:
        patches = jnp.pad(patches, ((0, Mp - M), (0, 0)))

    # K tiling: prefer the whole weight resident (constant index -> DMA'd once); otherwise
    # pick tk = 64*c with c an even divisor of Cin (tk % 128 == 0, divides K -> no K padding).
    def step_bytes(tk, multi):
        b = 2 * tm * tk * esize + 2 * tk * Coutp * esize + 2 * tm * Coutp * osize
        return b + (tm * Coutp * 4 if multi else 0)

    cands = [K] + sorted({64 * c for c in range(2, Cin + 1, 2)
                          if Cin % c == 0 and 64 * c < K}, reverse=True)
    tk = next((t for t in cands if step_bytes(t, t < K) <= budget), cands[-1])
    nkt = K // tk

    scratch = [pltpu.VMEM((tm, Coutp), jnp.float32)] if nkt > 1 else []

    out = pl.pallas_call(
        _matmul_kernel,
        out_shape=jax.ShapeDtypeStruct((Mp, Coutp), out_dtype),
        grid_spec=pltpu.PrefetchScalarGridSpec(
            num_scalar_prefetch=0,
            grid=(Mp // tm, nkt),
            in_specs=[
                pl.BlockSpec((tm, tk), lambda i, k: (i, k)),
                pl.BlockSpec((tk, Coutp), lambda i, k: (k, 0)),
                pl.BlockSpec((1, Coutp), lambda i, k: (0, 0)),
                pl.BlockSpec((1, Coutp), lambda i, k: (0, 0)),
            ],
            out_specs=pl.BlockSpec((tm, Coutp), lambda i, k: (i, 0)),
            scratch_shapes=scratch,
        ),
        compiler_params=pltpu.CompilerParams(
            dimension_semantics=("parallel", "arbitrary"),
            vmem_limit_bytes=budget,
        ),
    )(patches, w_mat, scale2d, bias2d)

    return out[:M, :Cout].reshape(N, Ho, Wo, Cout)


# --------------------------------------------------------------------------------------
# Public wrapper (matches the PyTorch module's forward semantics).
# --------------------------------------------------------------------------------------
def downsample_x8(x, weight, gamma, beta, running_mean, running_var, eps=1e-5, *,
                  compute_dtype=jnp.bfloat16, out_dtype=jnp.float32,
                  channels_last=False, use_fused=True):
    """Conv2d(k=8, s=8, p=0, bias=False) + BatchNorm2d(eval) + ReLU.

    x: (N, Cin, H, W); weight: (Cout, Cin, 8, 8). Returns NCHW (default) or NHWC.
    """
    N, Cin, H, W = x.shape
    Cout = weight.shape[0]
    Ho, Wo = H // 8, W // 8
    assert Ho > 0 and Wo > 0, "spatial dims must be >= 8"
    x = x[:, :, :Ho * 8, :Wo * 8]           # PyTorch Conv2d(k=8, s=8, p=0) floors H and W

    scale = (gamma / jnp.sqrt(running_var + eps)).astype(jnp.float32)      # (Cout,)
    bias = (beta - running_mean * scale).astype(jnp.float32)               # (Cout,)

    budget = _vmem_budget_bytes()
    Coutp = _round_up(Cout, 128)

    out = None
    if use_fused:
        th = _choose_fused_th(N, Cin, Ho, Wo, Coutp,
                              jnp.dtype(x.dtype).itemsize,
                              jnp.dtype(compute_dtype).itemsize,
                              jnp.dtype(out_dtype).itemsize, budget)
        if th is not None:
            try:
                out = _fused_downsample(x, weight, scale, bias, th=th,
                                        compute_dtype=compute_dtype,
                                        out_dtype=out_dtype, vmem_limit=budget)
                out = jax.block_until_ready(out)   # surface lowering/runtime issues here
            except Exception:
                out = None                         # fall back to the im2col matmul kernel
    if out is None:
        out = _matmul_downsample(x, weight, scale, bias, compute_dtype=compute_dtype,
                                 out_dtype=out_dtype, budget=budget)
    if not channels_last:
        out = out.transpose(0, 3, 1, 2)            # NHWC -> NCHW (PyTorch layout)
    return out


def _reference(x, weight, gamma, beta, running_mean, running_var, eps=1e-5):
    # Pure-JAX/XLA reference of Conv2d(k=8, s=8, p=0, bias=False) + BN(eval) + ReLU, all f32.
    y = jax.lax.conv_general_dilated(
        x, weight, window_strides=(8, 8), padding="VALID",
        dimension_numbers=("NCHW", "OIHW", "NCHW"))
    s = (gamma / jnp.sqrt(running_var + eps)).reshape(1, -1, 1, 1)
    b = (beta - running_mean * gamma / jnp.sqrt(running_var + eps)).reshape(1, -1, 1, 1)
    return jnp.maximum(y * s + b, 0.0)


if __name__ == "__main__":
    key = jax.random.PRNGKey(0)
    k_x, k_w, k_g, k_b = jax.random.split(key, 4)

    N, Cin, H, W = 2, 4, 16, 16
    Cout = 8

    x = jax.random.normal(k_x, (N, Cin, H, W), dtype=jnp.float32)
    weight = jax.random.normal(k_w, (Cout, Cin, 8, 8), dtype=jnp.float32) * 0.05
    gamma = 1.0 + 0.1 * jax.random.normal(k_g, (Cout,), dtype=jnp.float32)
    beta = 0.1 * jax.random.normal(k_b, (Cout,), dtype=jnp.float32)
    running_mean = 0.02 * jnp.arange(Cout, dtype=jnp.float32)
    running_var = 1.0 + 0.05 * jnp.arange(Cout, dtype=jnp.float32)

    ref = _reference(x, weight, gamma, beta, running_mean, running_var)

    # Production config: bf16 MXU operands, f32 accumulation + f32 BN/ReLU epilogue.
    out = downsample_x8(x, weight, gamma, beta, running_mean, running_var)
    out = jax.block_until_ready(out)
    assert out.shape == (N, Cout, H // 8, W // 8), out.shape
    assert jnp.allclose(out, ref, atol=5e-2, rtol=5e-2), float(jnp.max(jnp.abs(out - ref)))

    # Lowering-exactness check with f32 operands (tight tolerance).
    out_f32 = downsample_x8(x, weight, gamma, beta, running_mean, running_var,
                            compute_dtype=jnp.float32)
    out_f32 = jax.block_until_ready(out_f32)
    assert jnp.allclose(out_f32, ref, atol=1e-3, rtol=1e-3), \
        float(jnp.max(jnp.abs(out_f32 - ref)))

    # Exercise the im2col fallback path as well (used for oversized weight slabs).
    out_fb = downsample_x8(x, weight, gamma, beta, running_mean, running_var,
                           use_fused=False)
    out_fb = jax.block_until_ready(out_fb)
    assert out_fb.shape == (N, Cout, H // 8, W // 8), out_fb.shape
    assert jnp.allclose(out_fb, ref, atol=5e-2, rtol=5e-2), \
        float(jnp.max(jnp.abs(out_fb - ref)))

    print("KERNEL_OK")
</pallas_src>

<mosaic_0001>
module attributes {stable_mosaic.version = 11 : i64} {
  func.func @_matmul_kernel(%arg0: i32, %arg1: i32, %arg2: memref<128x256xbf16, #tpu.memory_space<vmem>>, %arg3: memref<256x128xbf16, #tpu.memory_space<vmem>>, %arg4: memref<1x128xf32, #tpu.memory_space<vmem>>, %arg5: memref<1x128xf32, #tpu.memory_space<vmem>>, %arg6: memref<128x128xf32, #tpu.memory_space<vmem>>) attributes {dimension_semantics = [#tpu.dimension_semantics<parallel>, #tpu.dimension_semantics<arbitrary>], iteration_bounds = array<i64: 1, 1>, scalar_prefetch = 0 : i64, scratch_operands = 0 : i64, tpu.core_type = #tpu.core_type<tc>, window_params = [{transform_indices = @transform_0, window_bounds = array<i64: 128, 256>}, {transform_indices = @transform_1, window_bounds = array<i64: 256, 128>}, {pipeline_mode = #tpu.pipeline_mode<synchronous>, transform_indices = @transform_2, window_bounds = array<i64: 1, 128>}, {pipeline_mode = #tpu.pipeline_mode<synchronous>, transform_indices = @transform_3, window_bounds = array<i64: 1, 128>}, {transform_indices = @transform_4, window_bounds = array<i64: 128, 128>}]} {
    %c0 = arith.constant 0 : index
    %c0_0 = arith.constant 0 : index
    %0 = vector.load %arg2[%c0, %c0_0] : memref<128x256xbf16, #tpu.memory_space<vmem>>, vector<128x256xbf16>
    %c0_1 = arith.constant 0 : index
    %c0_2 = arith.constant 0 : index
    %1 = vector.load %arg3[%c0_1, %c0_2] : memref<256x128xbf16, #tpu.memory_space<vmem>>, vector<256x128xbf16>
    %cst = arith.constant dense<0.000000e+00> : vector<128x128xf32>
    %2 = tpu.matmul %0, %1, %cst {dimension_numbers = #tpu.dot_dimension_numbers<[1], [0], [0], [1], [0, 0, 1, 1], [], []>} : vector<128x256xbf16>, vector<256x128xbf16>, vector<128x128xf32> -> vector<128x128xf32>
    %c0_3 = arith.constant 0 : index
    %c0_4 = arith.constant 0 : index
    %3 = vector.load %arg4[%c0_3, %c0_4] : memref<1x128xf32, #tpu.memory_space<vmem>>, vector<1x128xf32>
    %4 = vector.broadcast %3 : vector<1x128xf32> to vector<128x128xf32>
    %5 = arith.mulf %2, %4 : vector<128x128xf32>
    %c0_5 = arith.constant 0 : index
    %c0_6 = arith.constant 0 : index
    %6 = vector.load %arg5[%c0_5, %c0_6] : memref<1x128xf32, #tpu.memory_space<vmem>>, vector<1x128xf32>
    %7 = vector.broadcast %6 : vector<1x128xf32> to vector<128x128xf32>
    %8 = arith.addf %5, %7 : vector<128x128xf32>
    %cst_7 = arith.constant 0.000000e+00 : f32
    %9 = vector.broadcast %cst_7 : f32 to vector<128x128xf32>
    %10 = arith.maximumf %8, %9 : vector<128x128xf32>
    %c0_8 = arith.constant 0 : index
    %c0_9 = arith.constant 0 : index
    %11 = vector.load %arg6[%c0_8, %c0_9] : memref<128x128xf32, #tpu.memory_space<vmem>>, vector<128x128xf32>
    tpu.vector_store %arg6[%c0_8, %c0_9], %10 {strides = array<i32>} : memref<128x128xf32, #tpu.memory_space<vmem>>, vector<128x128xf32>,
    return
  }
  func.func @transform_0(%arg0: i32, %arg1: i32) -> (i32, i32) {
    %c0_i32 = arith.constant 0 : i32
    return %arg0, %arg1 : i32, i32
  }
  func.func @transform_1(%arg0: i32, %arg1: i32) -> (i32, i32) {
    %c0_i32 = arith.constant 0 : i32
    %c0_i32_0 = arith.constant 0 : i32
    return %arg1, %c0_i32 : i32, i32
  }
  func.func @transform_2(%arg0: i32, %arg1: i32) -> (i32, i32) {
    %c0_i32 = arith.constant 0 : i32
    %c0_i32_0 = arith.constant 0 : i32
    %c0_i32_1 = arith.constant 0 : i32
    return %c0_i32, %c0_i32_0 : i32, i32
  }
  func.func @transform_3(%arg0: i32, %arg1: i32) -> (i32, i32) {
    %c0_i32 = arith.constant 0 : i32
    %c0_i32_0 = arith.constant 0 : i32
    %c0_i32_1 = arith.constant 0 : i32
    return %c0_i32, %c0_i32_0 : i32, i32
  }
  func.func @transform_4(%arg0: i32, %arg1: i32) -> (i32, i32) {
    %c0_i32 = arith.constant 0 : i32
    %c0_i32_0 = arith.constant 0 : i32
    return %arg0, %c0_i32 : i32, i32
  }
}

</mosaic_0001>

<bundles_post_ra>
// kernel: tpu_custom_call.1
= control target key start
LH: loop header
LB: loop body
LE: loop exit
PB: predicated region body
PF: predicated region fallthrough
CT: control target
= control target key end

     0   :  { %9 = vsyncpa [#allocation3], 0  ;;  %s816_s0 = inlined_call_operand.hbm [shape: bf16[128,256], index: 0, kind: input, shape index: {}]   ;;  %s817_s1 = inlined_call_operand.hbm [shape: bf16[256,128], index: 1, kind: input, shape index: {}]   ;;  %s818_s2 = inlined_call_operand.vmem [shape: f32[1,128], index: 2, kind: input, shape index: {}]   ;;  %s819_s3 = inlined_call_operand.vmem [shape: f32[1,128], index: 3, kind: input, shape index: {}]   ;;  %s820_s4 = inlined_call_operand.hbm [shape: f32[128,128], index: 4, kind: output, shape index: {}]  }
   0x1   :  { %10 = vsyncpa [#allocation6], 0 }
   0x2   :  { %11 = vsyncpa [#allocation4], 0  ;;  %s16_s17 = sshll.u32 %s816_s0, 4  ;;  %s727_s18 = smov [#allocation2]   ;;  %s17_s17 = int_to_ptr.hbm [resolvable:$true] %s16_s17 }
   0x3   :  { %s18_s19 = sshll.u32 %s727_s18, 4  ;;  %s29_s22 = sshll.u32 %s817_s1, 4  ;;  %s19_s19 = int_to_ptr.vmem [resolvable:$true] %s18_s19  ;;  %s30_s22 = int_to_ptr.hbm [resolvable:$true] %s29_s22 }
   0x4   :  { %s728_s23 = smov 128   ;;  %s729_s24 = smov 8  }
   0x5   :  { %24 = dma.hbm_to_vmem [thread:$0]  %s17_s17, 2048, %s19_s19, [#allocation3], %s728_s23, %s728_s23, %s729_s24  }
   0x6   :  { %s730_s25 = smov [#allocation5]   ;;  %s731_s27 = smov 64  }
   0x7   :  { %s31_s26 = sshll.u32 %s730_s25, 4  ;;  %s732_s0 = smov 4   ;;  %s32_s26 = int_to_ptr.vmem [resolvable:$true] %s31_s26 }
   0x8   :  { %37 = dma.hbm_to_vmem [thread:$0]  %s30_s22, 2048, %s32_s26, [#allocation6], %s731_s27, %s731_s27, %s732_s0  }
   0x9   :  { %721 = dma.done.wait [#allocation3], 2048  }
   0xa   :  { %722 = vsyncadd [#allocation3], 4294965248 }
   0xb   :  { %723 = dma.done.wait [#allocation6], 2048  }
   0xc   :  { %724 = vsyncadd [#allocation6], 4294965248  ;;  %v615_v0 = vld [vmem:[#allocation5 + $0x38] sm:$0xff]  ;;  %v614_v2 = vld [vmem:[#allocation5 + $0x30] sm:$0xff]  ;;  %s450_s7 = sshll.u32 %s820_s4, 4  ;;  %s451_s7 = int_to_ptr.hbm [resolvable:$true] %s450_s7 }
   0xd   :  { %v623_v1 = vld [vmem:[#allocation5 + $0x78] sm:$0xff]  ;;  %274 = vmatpush.bf16.msra.mxu0 %v615_v0  ;;  %624 = vmatpush.bf16.msra.mxu2 %v615_v0  ;;  %v622_v3 = vld [vmem:[#allocation5 + $0x70] sm:$0xff]  ;;  %v613_v4 = vld [vmem:[#allocation5 + $0x28] sm:$0xff] }
   0xe   :  { %323 = vmatpush.bf16.msra.mxu1 %v623_v1  ;;  %632 = vmatpush.bf16.msra.mxu3 %v623_v1  ;;  %v621_v5 = vld [vmem:[#allocation5 + $0x68] sm:$0xff]  ;;  %v612_v6 = vld [vmem:[#allocation5 + $0x20] sm:$0xff]  ;;  %v611_v8 = vld [vmem:[#allocation5 + $0x18] sm:$0xff] }
   0xf   :  { %v620_v7 = vld [vmem:[#allocation5 + $0x60] sm:$0xff]  ;;  %v619_v9 = vld [vmem:[#allocation5 + $0x58] sm:$0xff]  ;;  %v610_v10 = vld [vmem:[#allocation5 + $0x10] sm:$0xff] }
  0x10   :  { %v618_v11 = vld [vmem:[#allocation5 + $0x50] sm:$0xff]  ;;  %v609_v12 = vld [vmem:[#allocation5 + $0x8] sm:$0xff]  ;;  %v608_v14 = vld [vmem:[#allocation5] sm:$0xff] }
  0x11   :  { %275 = vmatpush.bf16.msra.mxu0 %v614_v2  ;;  %625 = vmatpush.bf16.msra.mxu2 %v614_v2  ;;  %v617_v13 = vld [vmem:[#allocation5 + $0x48] sm:$0xff]  ;;  %v616_v15 = vld [vmem:[#allocation5 + $0x40] sm:$0xff]  ;;  %v474_v28 = vld [vmem:[#allocation2 + $0x10] sm:$0xf] }
  0x12   :  { %324 = vmatpush.bf16.msra.mxu1 %v622_v3  ;;  %633 = vmatpush.bf16.msra.mxu3 %v622_v3  ;;  %v466_v16 = vld [vmem:[#allocation2] sm:$0xf]  ;;  %v593_v17 = vld [vmem:[#allocation2 + $0x4] sm:$0xf0]  ;;  %v592_v20 = vld [vmem:[#allocation2 + $0x4] sm:$0xf] }
  0x13   :  { %v498_v18 = vld [vmem:[#allocation2 + $0x40] sm:$0xf]  ;;  %v601_v19 = vld [vmem:[#allocation2 + $0x44] sm:$0xf0]  ;;  %v468_v21 = vld [vmem:[#allocation2 + $0x8] sm:$0xf0]  ;;  %v467_v24 = vor.u32 %v593_v17, %v466_v16 }
  0x14   :  { %v600_v22 = vld [vmem:[#allocation2 + $0x44] sm:$0xf]  ;;  %v500_v23 = vld [vmem:[#allocation2 + $0x48] sm:$0xf0]  ;;  %v499_v25 = vor.u32 %v601_v19, %v498_v18  ;;  %v471_v26 = vor.u32 %v592_v20, %v468_v21  ;;  %v595_v29 = vld [vmem:[#allocation2 + $0x14] sm:$0xf0] }
  0x15   :  { %276 = vmatpush.bf16.msra.mxu0 %v613_v4  ;;  %626 = vmatpush.bf16.msra.mxu2 %v613_v4  ;;  %v503_v27 = vor.u32 %v600_v22, %v500_v23  ;;  %v506_v30 = vld [vmem:[#allocation2 + $0x50] sm:$0xf]  ;;  %v603_v31 = vld [vmem:[#allocation2 + $0x54] sm:$0xf0]  ;;  %v594_v32 = vld [vmem:[#allocation2 + $0x14] sm:$0xf]  ;;  %v475_v36 = vor.u32 %v595_v29, %v474_v28 }
  0x16   :  { %325 = vmatpush.bf16.msra.mxu1 %v621_v5  ;;  %634 = vmatpush.bf16.msra.mxu3 %v621_v5  ;;  %v476_v33 = vld [vmem:[#allocation2 + $0x18] sm:$0xf0]  ;;  %v602_v34 = vld [vmem:[#allocation2 + $0x54] sm:$0xf]  ;;  %v507_v37 = vor.u32 %v603_v31, %v506_v30  ;;  %v482_v40 = vld [vmem:[#allocation2 + $0x20] sm:$0xf] }
  0x17   :  { %v508_v35 = vld [vmem:[#allocation2 + $0x58] sm:$0xf0]  ;;  %v479_v38 = vor.u32 %v594_v32, %v476_v33  ;;  %v597_v41 = vld [vmem:[#allocation2 + $0x24] sm:$0xf0]  ;;  %v514_v42 = vld [vmem:[#allocation2 + $0x60] sm:$0xf] }
  0x18   :  { %v511_v39 = vor.u32 %v602_v34, %v508_v35  ;;  %v605_v43 = vld [vmem:[#allocation2 + $0x64] sm:$0xf0]  ;;  %v596_v44 = vld [vmem:[#allocation2 + $0x24] sm:$0xf]  ;;  %v484_v45 = vld [vmem:[#allocation2 + $0x28] sm:$0xf0]  ;;  %v483_v48 = vor.u32 %v597_v41, %v482_v40 }
  0x19   :  { %277 = vmatpush.bf16.msra.mxu0 %v612_v6  ;;  %627 = vmatpush.bf16.msra.mxu2 %v612_v6  ;;  %v604_v46 = vld [vmem:[#allocation2 + $0x64] sm:$0xf]  ;;  %v516_v47 = vld [vmem:[#allocation2 + $0x68] sm:$0xf0]  ;;  %v515_v49 = vor.u32 %v605_v43, %v514_v42  ;;  %v487_v50 = vor.u32 %v596_v44, %v484_v45  ;;  %v490_v52 = vld [vmem:[#allocation2 + $0x30] sm:$0xf] }
  0x1a   :  { %326 = vmatpush.bf16.msra.mxu1 %v620_v7  ;;  %635 = vmatpush.bf16.msra.mxu3 %v620_v7  ;;  %v519_v51 = vor.u32 %v604_v46, %v516_v47  ;;  %v599_v53 = vld [vmem:[#allocation2 + $0x34] sm:$0xf0]  ;;  %v522_v54 = vld [vmem:[#allocation2 + $0x70] sm:$0xf]  ;;  %v598_v56 = vld [vmem:[#allocation2 + $0x34] sm:$0xf] }
  0x1b   :  { %v607_v55 = vld [vmem:[#allocation2 + $0x74] sm:$0xf0]  ;;  %v492_v57 = vld [vmem:[#allocation2 + $0x38] sm:$0xf0]  ;;  %v606_v58 = vld [vmem:[#allocation2 + $0x74] sm:$0xf]  ;;  %v491_v60 = vor.u32 %v599_v53, %v490_v52 }
  0x1c   :  { %v524_v59 = vld [vmem:[#allocation2 + $0x78] sm:$0xf0]  ;;  %v523_v61 = vor.u32 %v607_v55, %v522_v54  ;;  %v495_v62 = vor.u32 %v598_v56, %v492_v57  ;;  %v771_v1 = vld [vmem:[%s818_s2] ss:$0 sm:$0xff]  ;;  %s733_s2 = smov [#allocation7]  }
  0x1d   :  { %278 = vmatpush.bf16.msra.mxu0 %v611_v8  ;;  %628 = vmatpush.bf16.msra.mxu2 %v611_v8  ;;  %v527_v63 = vor.u32 %v606_v58, %v524_v59  ;;  %v776_v4 = vld [vmem:[%s819_s3] ss:$0 sm:$0xff]  ;;  %s448_s3 = sshll.u32 %s733_s2, 4  ;;  %s449_s3 = int_to_ptr.vmem [resolvable:$true] %s448_s3 }
  0x1e   :  { %327 = vmatpush.bf16.msra.mxu1 %v619_v9  ;;  %636 = vmatpush.bf16.msra.mxu3 %v619_v9 }
  0x21   :  { %279 = vmatpush.bf16.msra.mxu0 %v610_v10  ;;  %629 = vmatpush.bf16.msra.mxu2 %v610_v10 }
  0x22   :  { %328 = vmatpush.bf16.msra.mxu1 %v618_v11  ;;  %637 = vmatpush.bf16.msra.mxu3 %v618_v11 }
  0x25   :  { %280 = vmatpush.bf16.msra.mxu0 %v609_v12  ;;  %630 = vmatpush.bf16.msra.mxu2 %v609_v12 }
  0x26   :  { %329 = vmatpush.bf16.msra.mxu1 %v617_v13  ;;  %638 = vmatpush.bf16.msra.mxu3 %v617_v13 }
  0x29   :  { %281 = vmatpush.bf16.msra.mxu0 %v608_v14  ;;  %631 = vmatpush.bf16.msra.mxu2 %v608_v14 }
  0x2a   :  { %330 = vmatpush.bf16.msra.mxu1 %v616_v15  ;;  %639 = vmatpush.bf16.msra.mxu3 %v616_v15 }
  0x2c   :  { %282 = vmatmul.bf16.vlgmr.msra.gmra.mxu0 %v467_v24  ;;  %302 = vmatmul.bf16.vlgmr.msra.gmra.mxu2 %v499_v25 }
  0x2d   :  { %331 = vmatmul.bf16.vlgmr.msra.gmra.mxu1 %v471_v26  ;;  %351 = vmatmul.bf16.vlgmr.msra.gmra.mxu3 %v503_v27 }
  0x3c   :  { %287 = vmatmul.bf16.gmra.mxu0 %v475_v36  ;;  %307 = vmatmul.bf16.gmra.mxu2 %v507_v37 }
  0x3d   :  { %336 = vmatmul.bf16.gmra.mxu1 %v479_v38  ;;  %356 = vmatmul.bf16.gmra.mxu3 %v511_v39 }
  0x4c   :  { %292 = vmatmul.bf16.gmra.mxu0 %v483_v48  ;;  %312 = vmatmul.bf16.gmra.mxu2 %v515_v49 }
  0x4d   :  { %341 = vmatmul.bf16.gmra.mxu1 %v487_v50  ;;  %361 = vmatmul.bf16.gmra.mxu3 %v519_v51 }
  0x5c   :  { %297 = vmatmul.bf16.gmra.mxu0 %v491_v60  ;;  %317 = vmatmul.bf16.gmra.mxu2 %v523_v61 }
  0x5d   :  { %346 = vmatmul.bf16.gmra.mxu1 %v495_v62  ;;  %366 = vmatmul.bf16.gmra.mxu3 %v527_v63 }
  0xa9   :  { %v283_v0 = vpop.f32.mrf.mxu0 }
  0xaa   :  { %v332_v2 = vpop.f32.mrf.mxu1 }
  0xab   :  { %v333_v3 = vadd.f32 %v332_v2, %v283_v0 }
  0xad   :  { %v376_v5 = vmul.f32 %v771_v1, %v333_v3 }
  0xaf   :  { %v396_v6 = vadd.f32 %v776_v4, %v376_v5  ;;  %v303_v7 = vpop.f32.mrf.mxu2 }
  0xb0   :  { %v352_v8 = vpop.f32.mrf.mxu3 }
  0xb1   :  { %v412_v9 = vmax.f32 %v396_v6, 0.0  ;;  %v353_v10 = vadd.f32 %v352_v8, %v303_v7  ;;  %v285_v11 = vpop.f32.mrf.mxu0 }
  0xb2   :  { %v334_v12 = vpop.f32.mrf.mxu1 }
  0xb3   :  { %428 = vst [vmem:[#allocation7] sm:$0xff] %v412_v9  ;;  %v384_v13 = vmul.f32 %v771_v1, %v353_v10  ;;  %v335_v14 = vadd.f32 %v334_v12, %v285_v11 }
  0xb5   :  { %v404_v15 = vadd.f32 %v776_v4, %v384_v13  ;;  %v377_v16 = vmul.f32 %v771_v1, %v335_v14 }
  0xb7   :  { %v420_v17 = vmax.f32 %v404_v15, 0.0  ;;  %v397_v18 = vadd.f32 %v776_v4, %v377_v16  ;;  %v305_v19 = vpop.f32.mrf.mxu2 }
  0xb8   :  { %v354_v20 = vpop.f32.mrf.mxu3 }
  0xb9   :  { %436 = vst [vmem:[#allocation7 + $0x40] sm:$0xff] %v420_v17  ;;  %v413_v21 = vmax.f32 %v397_v18, 0.0  ;;  %v355_v22 = vadd.f32 %v354_v20, %v305_v19  ;;  %v288_v23 = vpop.f32.mrf.mxu0 }
  0xba   :  { %v337_v24 = vpop.f32.mrf.mxu1 }
  0xbb   :  { %429 = vst [vmem:[#allocation7 + $0x8] sm:$0xff] %v413_v21  ;;  %v385_v25 = vmul.f32 %v771_v1, %v355_v22  ;;  %v338_v26 = vadd.f32 %v337_v24, %v288_v23 }
  0xbd   :  { %v405_v27 = vadd.f32 %v776_v4, %v385_v25  ;;  %v378_v28 = vmul.f32 %v771_v1, %v338_v26 }
  0xbf   :  { %v421_v29 = vmax.f32 %v405_v27, 0.0  ;;  %v398_v30 = vadd.f32 %v776_v4, %v378_v28  ;;  %v308_v31 = vpop.f32.mrf.mxu2 }
  0xc0   :  { %v357_v32 = vpop.f32.mrf.mxu3 }
  0xc1   :  { %437 = vst [vmem:[#allocation7 + $0x48] sm:$0xff] %v421_v29  ;;  %v414_v33 = vmax.f32 %v398_v30, 0.0  ;;  %v358_v34 = vadd.f32 %v357_v32, %v308_v31  ;;  %v290_v35 = vpop.f32.mrf.mxu0 }
  0xc2   :  { %v339_v36 = vpop.f32.mrf.mxu1 }
  0xc3   :  { %430 = vst [vmem:[#allocation7 + $0x10] sm:$0xff] %v414_v33  ;;  %v386_v37 = vmul.f32 %v771_v1, %v358_v34  ;;  %v340_v38 = vadd.f32 %v339_v36, %v290_v35 }
  0xc5   :  { %v406_v39 = vadd.f32 %v776_v4, %v386_v37  ;;  %v379_v40 = vmul.f32 %v771_v1, %v340_v38 }
  0xc7   :  { %v422_v41 = vmax.f32 %v406_v39, 0.0  ;;  %v399_v42 = vadd.f32 %v776_v4, %v379_v40  ;;  %v310_v43 = vpop.f32.mrf.mxu2 }
  0xc8   :  { %v359_v44 = vpop.f32.mrf.mxu3 }
  0xc9   :  { %438 = vst [vmem:[#allocation7 + $0x50] sm:$0xff] %v422_v41  ;;  %v415_v45 = vmax.f32 %v399_v42, 0.0  ;;  %v360_v46 = vadd.f32 %v359_v44, %v310_v43  ;;  %v293_v47 = vpop.f32.mrf.mxu0 }
  0xca   :  { %v342_v48 = vpop.f32.mrf.mxu1 }
  0xcb   :  { %431 = vst [vmem:[#allocation7 + $0x18] sm:$0xff] %v415_v45  ;;  %v387_v49 = vmul.f32 %v771_v1, %v360_v46  ;;  %v343_v50 = vadd.f32 %v342_v48, %v293_v47 }
  0xcd   :  { %v407_v51 = vadd.f32 %v776_v4, %v387_v49  ;;  %v380_v52 = vmul.f32 %v771_v1, %v343_v50 }
  0xcf   :  { %v423_v53 = vmax.f32 %v407_v51, 0.0  ;;  %v400_v54 = vadd.f32 %v776_v4, %v380_v52  ;;  %v313_v55 = vpop.f32.mrf.mxu2 }
  0xd0   :  { %v362_v56 = vpop.f32.mrf.mxu3 }
  0xd1   :  { %439 = vst [vmem:[#allocation7 + $0x58] sm:$0xff] %v423_v53  ;;  %v416_v57 = vmax.f32 %v400_v54, 0.0  ;;  %v363_v58 = vadd.f32 %v362_v56, %v313_v55  ;;  %v295_v59 = vpop.f32.mrf.mxu0 }
  0xd2   :  { %v344_v60 = vpop.f32.mrf.mxu1 }
  0xd3   :  { %432 = vst [vmem:[#allocation7 + $0x20] sm:$0xff] %v416_v57  ;;  %v388_v61 = vmul.f32 %v771_v1, %v363_v58  ;;  %v345_v62 = vadd.f32 %v344_v60, %v295_v59 }
  0xd5   :  { %v408_v63 = vadd.f32 %v776_v4, %v388_v61  ;;  %v381_v0 = vmul.f32 %v771_v1, %v345_v62 }
  0xd7   :  { %v424_v2 = vmax.f32 %v408_v63, 0.0  ;;  %v401_v3 = vadd.f32 %v776_v4, %v381_v0  ;;  %v315_v5 = vpop.f32.mrf.mxu2 }
  0xd8   :  { %v364_v6 = vpop.f32.mrf.mxu3 }
  0xd9   :  { %440 = vst [vmem:[#allocation7 + $0x60] sm:$0xff] %v424_v2  ;;  %v417_v7 = vmax.f32 %v401_v3, 0.0  ;;  %v365_v8 = vadd.f32 %v364_v6, %v315_v5  ;;  %v298_v9 = vpop.f32.mrf.mxu0 }
  0xda   :  { %v347_v10 = vpop.f32.mrf.mxu1 }
  0xdb   :  { %433 = vst [vmem:[#allocation7 + $0x28] sm:$0xff] %v417_v7  ;;  %v389_v11 = vmul.f32 %v771_v1, %v365_v8  ;;  %v348_v12 = vadd.f32 %v347_v10, %v298_v9 }
  0xdd   :  { %v409_v13 = vadd.f32 %v776_v4, %v389_v11  ;;  %v382_v14 = vmul.f32 %v771_v1, %v348_v12 }
  0xdf   :  { %v425_v15 = vmax.f32 %v409_v13, 0.0  ;;  %v402_v16 = vadd.f32 %v776_v4, %v382_v14  ;;  %v318_v17 = vpop.f32.mrf.mxu2 }
  0xe0   :  { %v367_v18 = vpop.f32.mrf.mxu3 }
  0xe1   :  { %441 = vst [vmem:[#allocation7 + $0x68] sm:$0xff] %v425_v15  ;;  %v418_v19 = vmax.f32 %v402_v16, 0.0  ;;  %v368_v20 = vadd.f32 %v367_v18, %v318_v17  ;;  %v300_v21 = vpop.f32.mrf.mxu0 }
  0xe2   :  { %v349_v22 = vpop.f32.mrf.mxu1 }
  0xe3   :  { %434 = vst [vmem:[#allocation7 + $0x30] sm:$0xff] %v418_v19  ;;  %v390_v23 = vmul.f32 %v771_v1, %v368_v20  ;;  %v350_v24 = vadd.f32 %v349_v22, %v300_v21 }
  0xe5   :  { %v410_v25 = vadd.f32 %v776_v4, %v390_v23  ;;  %v383_v26 = vmul.f32 %v771_v1, %v350_v24 }
  0xe7   :  { %v426_v27 = vmax.f32 %v410_v25, 0.0  ;;  %v403_v28 = vadd.f32 %v776_v4, %v383_v26  ;;  %v320_v29 = vpop.f32.mrf.mxu2 }
  0xe8   :  { %v369_v30 = vpop.f32.mrf.mxu3 }
  0xe9   :  { %442 = vst [vmem:[#allocation7 + $0x70] sm:$0xff] %v426_v27  ;;  %v419_v31 = vmax.f32 %v403_v28, 0.0  ;;  %v370_v32 = vadd.f32 %v369_v30, %v320_v29 }
  0xeb   :  { %435 = vst [vmem:[#allocation7 + $0x38] sm:$0xff] %v419_v31  ;;  %v391_v33 = vmul.f32 %v771_v1, %v370_v32 }
  0xed   :  { %v411_v34 = vadd.f32 %v776_v4, %v391_v33 }
  0xef   :  { %v427_v35 = vmax.f32 %v411_v34, 0.0 }
  0xf1   :  { %443 = vst [vmem:[#allocation7 + $0x78] sm:$0xff] %v427_v35 }
  0xf2   :  { %456 = dma.vmem_to_hbm [thread:$0]  %s449_s3, 2048, %s451_s7, [#allocation4], %s728_s23, %s728_s23, %s729_s24  }
  0xf3   :  { %725 = dma.done.wait [#allocation4], 2048  }
  0xf4   :  { %726 = vsyncadd [#allocation4], 4294965248 }
  0xf5   :  { %461 = vsyncpa [#allocation3], 1 }
  0xf6   :  { %462 = vsyncpa [#allocation6], 1 }
  0xf7   :  { %463 = vsyncpa [#allocation4], 1 }

</bundles_post_ra>
